<compile_context>
chip_gen: v7x
topology: tpu7x:2x2x1
jax: 0.10.0
libtpu: 0.0.40
codegen_flags: <defaults>
</compile_context>

<pallas_src>
import jax
import jax.numpy as jnp
from jax import lax
from jax.experimental import pallas as pl
from jax.experimental.pallas import tpu as pltpu


def _mlp_kernel(x_ref, w1t_ref, b1_ref, w2t_ref, b2_ref, w3_ref, b3_ref, o_ref):
    """One batch tile.  x tile: (block_b, C) native layout.  Output: (1, block_b).

    Batch rides the lane axis for every intermediate and for the output store.
    """
    # Layer 1: contract over C: (32, C) . (block_b, C)^T -> (32, block_b).
    # Cast to the compute dtype in VMEM (not in the wrapper); f32 MXU accumulation.
    x = x_ref[...].astype(w1t_ref.dtype)
    h1 = lax.dot_general(w1t_ref[...], x,
                         dimension_numbers=(((1,), (1,)), ((), ())),
                         preferred_element_type=jnp.float32)
    h1 = jnp.maximum(h1 + b1_ref[...], 0.0)                         # f32 VPU, lane-dense

    # Layer 2: (16, 32) @ (32, block_b) -> (16, block_b), f32 MXU accumulation.
    h2 = jnp.dot(w2t_ref[...], h1.astype(w2t_ref.dtype),
                 preferred_element_type=jnp.float32)
    h2 = jnp.maximum(h2 + b2_ref[...], 0.0)

    # Layer 3 (16 -> 1): VPU/XLU reduction in f32 (skip the near-empty MXU pass).
    z = jnp.sum(w3_ref[...] * h2, axis=0, keepdims=True) + b3_ref[...]   # (1, block_b)
    o_ref[...] = jax.nn.sigmoid(z).astype(o_ref.dtype)              # EUP, lane-dense store


def _round_up(x, m):
    return ((x + m - 1) // m) * m


def _pick_block_b(B, C, vmem_budget_bytes=24 << 20):
    """Lane-aligned batch tile size.

    Prefers 512-2048-lane tiles; targets >= 8 grid steps when the batch is large enough
    (v7x megacore + DMA/compute overlap) without shrinking tiles below 512 lanes on
    single-TC parts; respects a conservative per-step VMEM budget (x tile is lane-padded
    to 128 in VMEM, double-buffered).
    """
    lanes_c = _round_up(max(C, 1), 128)
    per_col = 2 * lanes_c * 4 + (32 + 16) * 4 + 2 * 8 * 4
    budget_cap = max(128, (vmem_budget_bytes // per_col) // 128 * 128)
    bb = min(2048, budget_cap)
    steps_cap = _round_up(max(pl.cdiv(B, 8), 1), 128)    # aim for >= 8 steps ...
    bb = min(bb, max(512, steps_cap))                    # ... but never below 512 lanes
    bb = min(bb, _round_up(max(B, 1), 128))              # small batches: one 128 tile
    return max(128, bb)


def my_neural_forward(x, params, *, block_b=None, compute_dtype=jnp.bfloat16):
    """Fused MLP forward on TPU via a single Pallas kernel.

    x: (B, C) float32 (or bfloat16)
    params: dict with w1 (C,32), b1 (1,32), w2 (32,16), b2 (1,16), w3 (16,1), b3 (1,1)

    Note: compute_dtype=bfloat16 introduces ~1e-2 relative error; pass jnp.float32 if
    f32-exact sigmoid outputs near the 0.5 decision boundary are required.
    """
    B, C = x.shape
    if block_b is None:
        block_b = _pick_block_b(B, C)
    block_b = max(128, _round_up(block_b, 128))          # lane-dense tiles, (8,128) rule

    # No transpose / cast / pad of x here: the kernel reads x in its native (B, C) layout
    # and the grid handles a partial last tile (masked output store).  Only a tiny batch
    # (< 128 rows) is zero-padded so the block never exceeds the array; those padded
    # columns (and any garbage rows of a partial tile) are column-independent and are
    # sliced off / masked out of the output -- do not "optimize" the slice away.
    x_in = x
    B_eff = B
    if B < 128:
        x_in = jnp.pad(x, ((0, 128 - B), (0, 0)))
        B_eff = 128
    block_b = min(block_b, _round_up(B_eff, 128))
    grid = (pl.cdiv(B_eff, block_b),)

    # Weights are tiny: cast/transpose host-side. Biases and w3 stay f32 (VPU/EUP math;
    # v5e has no bf16 VPU).
    w1t = params["w1"].T.astype(compute_dtype)                      # (32, C)
    w2t = params["w2"].T.astype(compute_dtype)                      # (16, 32)
    b1 = params["b1"].reshape(32, 1).astype(jnp.float32)            # broadcast over lanes
    b2 = params["b2"].reshape(16, 1).astype(jnp.float32)
    w3 = params["w3"].reshape(16, 1).astype(jnp.float32)
    b3 = params["b3"].reshape(1, 1).astype(jnp.float32)

    def const(arr):
        # Constant block index -> stays resident in VMEM across grid steps (no re-DMA).
        return pl.BlockSpec(arr.shape, lambda i: (0, 0))

    out = pl.pallas_call(
        _mlp_kernel,
        out_shape=jax.ShapeDtypeStruct((1, B_eff), jnp.float32),
        grid_spec=pltpu.PrefetchScalarGridSpec(
            num_scalar_prefetch=0,
            grid=grid,
            in_specs=[
                pl.BlockSpec((block_b, C), lambda i: (i, 0)),       # x tile, native layout
                const(w1t), const(b1),
                const(w2t), const(b2),
                const(w3), const(b3),
            ],
            out_specs=pl.BlockSpec((1, block_b), lambda i: (0, i)),
        ),
        compiler_params=pltpu.CompilerParams(
            dimension_semantics=("parallel",),
            vmem_limit_bytes=32 << 20,
        ),
    )(x_in, w1t, b1, w2t, b2, w3, b3)

    # (1, B_eff) -> (B, 1): slice + reshape, no transpose copy.
    return out[0, :B].reshape(B, 1)


def my_neural_apply(x, params):
    """Dispatcher: the kernel pays off once the batch is non-trivial; tiny batches are
    better served by a plain fused XLA computation."""
    if x.shape[0] < 1024:
        return reference_forward(x, params)
    return my_neural_forward(x, params)


def init_params(columns, key):
    """Deterministic init mirroring MyNeural.__init__ shapes (PyTorch-style uniform)."""
    ks = jax.random.split(key, 6)

    def linear(kw, kb, fan_in, fan_out):
        bound = 1.0 / jnp.sqrt(fan_in)
        w = jax.random.uniform(kw, (fan_in, fan_out), jnp.float32, -bound, bound)
        b = jax.random.uniform(kb, (1, fan_out), jnp.float32, -bound, bound)
        return w, b

    w1, b1 = linear(ks[0], ks[1], columns, 32)
    w2, b2 = linear(ks[2], ks[3], 32, 16)
    w3, b3 = linear(ks[4], ks[5], 16, 1)
    return {"w1": w1, "b1": b1, "w2": w2, "b2": b2, "w3": w3, "b3": b3}


def reference_forward(x, p):
    h = jnp.maximum(x @ p["w1"] + p["b1"], 0.0)
    h = jnp.maximum(h @ p["w2"] + p["b2"], 0.0)
    return jax.nn.sigmoid(h @ p["w3"] + p["b3"])


if __name__ == "__main__":
    key = jax.random.PRNGKey(0)
    k_x1, k_x2, k_p = jax.random.split(key, 3)

    columns = 16
    params = init_params(columns, k_p)

    # Small case (B < 128: single 128-wide padded tile): exact f32 compute path.
    x_small = jax.random.normal(k_x1, (8, columns), jnp.float32)
    out_small = jax.block_until_ready(
        my_neural_forward(x_small, params, compute_dtype=jnp.float32))
    ref_small = reference_forward(x_small, params)
    assert out_small.shape == (8, 1)
    assert jnp.allclose(out_small, ref_small, atol=1e-5, rtol=1e-5)

    # Larger case: grid > 1 with a partial (masked) last tile, bf16 compute path.
    x_big = jax.random.normal(k_x2, (1000, columns), jnp.float32)
    out_big = jax.block_until_ready(
        my_neural_forward(x_big, params, compute_dtype=jnp.bfloat16))
    ref_big = reference_forward(x_big, params)
    assert out_big.shape == (1000, 1)
    assert jnp.allclose(out_big, ref_big, atol=3e-2, rtol=3e-2)

    print("KERNEL_OK")
</pallas_src>

<mosaic_0001>
module attributes {stable_mosaic.version = 11 : i64} {
  func.func @_mlp_kernel(%arg0: i32, %arg1: memref<128x16xf32, #tpu.memory_space<vmem>>, %arg2: memref<32x16xf32, #tpu.memory_space<vmem>>, %arg3: memref<32x1xf32, #tpu.memory_space<vmem>>, %arg4: memref<16x32xf32, #tpu.memory_space<vmem>>, %arg5: memref<16x1xf32, #tpu.memory_space<vmem>>, %arg6: memref<16x1xf32, #tpu.memory_space<vmem>>, %arg7: memref<1x1xf32, #tpu.memory_space<vmem>>, %arg8: memref<1x128xf32, #tpu.memory_space<vmem>>) attributes {dimension_semantics = [#tpu.dimension_semantics<parallel>], iteration_bounds = array<i64: 1>, scalar_prefetch = 0 : i64, scratch_operands = 0 : i64, tpu.core_type = #tpu.core_type<tc>, window_params = [{transform_indices = @transform_0, window_bounds = array<i64: 128, 16>}, {pipeline_mode = #tpu.pipeline_mode<synchronous>, transform_indices = @transform_1, window_bounds = array<i64: 32, 16>}, {pipeline_mode = #tpu.pipeline_mode<synchronous>, transform_indices = @transform_2, window_bounds = array<i64: 32, 1>}, {pipeline_mode = #tpu.pipeline_mode<synchronous>, transform_indices = @transform_3, window_bounds = array<i64: 16, 32>}, {pipeline_mode = #tpu.pipeline_mode<synchronous>, transform_indices = @transform_4, window_bounds = array<i64: 16, 1>}, {pipeline_mode = #tpu.pipeline_mode<synchronous>, transform_indices = @transform_5, window_bounds = array<i64: 16, 1>}, {pipeline_mode = #tpu.pipeline_mode<synchronous>, transform_indices = @transform_6, window_bounds = array<i64: 1, 1>}, {transform_indices = @transform_7, window_bounds = array<i64: 1, 128>}]} {
    %c0 = arith.constant 0 : index
    %c0_0 = arith.constant 0 : index
    %0 = vector.load %arg1[%c0, %c0_0] : memref<128x16xf32, #tpu.memory_space<vmem>>, vector<128x16xf32>
    %c0_1 = arith.constant 0 : index
    %c0_2 = arith.constant 0 : index
    %1 = vector.load %arg2[%c0_1, %c0_2] : memref<32x16xf32, #tpu.memory_space<vmem>>, vector<32x16xf32>
    %cst = arith.constant dense<0.000000e+00> : vector<32x128xf32>
    %2 = tpu.matmul %1, %0, %cst {dimension_numbers = #tpu.dot_dimension_numbers<[1], [1], [0], [0], [0, 0, 1, 0], [], []>} : vector<32x16xf32>, vector<128x16xf32>, vector<32x128xf32> -> vector<32x128xf32>
    %c0_3 = arith.constant 0 : index
    %c0_4 = arith.constant 0 : index
    %3 = vector.load %arg3[%c0_3, %c0_4] : memref<32x1xf32, #tpu.memory_space<vmem>>, vector<32x1xf32>
    %4 = vector.broadcast %3 : vector<32x1xf32> to vector<32x128xf32>
    %5 = arith.addf %2, %4 : vector<32x128xf32>
    %cst_5 = arith.constant 0.000000e+00 : f32
    %6 = vector.broadcast %cst_5 : f32 to vector<32x128xf32>
    %7 = arith.maximumf %5, %6 : vector<32x128xf32>
    %c0_6 = arith.constant 0 : index
    %c0_7 = arith.constant 0 : index
    %8 = vector.load %arg4[%c0_6, %c0_7] : memref<16x32xf32, #tpu.memory_space<vmem>>, vector<16x32xf32>
    %cst_8 = arith.constant dense<0.000000e+00> : vector<16x128xf32>
    %9 = tpu.matmul %8, %7, %cst_8 {dimension_numbers = #tpu.dot_dimension_numbers<[1], [0], [0], [1], [0, 0, 1, 1], [], []>} : vector<16x32xf32>, vector<32x128xf32>, vector<16x128xf32> -> vector<16x128xf32>
    %c0_9 = arith.constant 0 : index
    %c0_10 = arith.constant 0 : index
    %10 = vector.load %arg5[%c0_9, %c0_10] : memref<16x1xf32, #tpu.memory_space<vmem>>, vector<16x1xf32>
    %11 = vector.broadcast %10 : vector<16x1xf32> to vector<16x128xf32>
    %12 = arith.addf %9, %11 : vector<16x128xf32>
    %cst_11 = arith.constant 0.000000e+00 : f32
    %13 = vector.broadcast %cst_11 : f32 to vector<16x128xf32>
    %14 = arith.maximumf %12, %13 : vector<16x128xf32>
    %c0_12 = arith.constant 0 : index
    %c0_13 = arith.constant 0 : index
    %15 = vector.load %arg6[%c0_12, %c0_13] : memref<16x1xf32, #tpu.memory_space<vmem>>, vector<16x1xf32>
    %16 = vector.broadcast %15 : vector<16x1xf32> to vector<16x128xf32>
    %17 = arith.mulf %16, %14 : vector<16x128xf32>
    %cst_14 = arith.constant dense<0.000000e+00> : vector<128xf32>
    %18 = vector.multi_reduction <add>, %17, %cst_14 [0] : vector<16x128xf32> to vector<128xf32>
    %19 = vector.shape_cast %18 : vector<128xf32> to vector<1x128xf32>
    %c0_15 = arith.constant 0 : index
    %c0_16 = arith.constant 0 : index
    %20 = vector.load %arg7[%c0_15, %c0_16] : memref<1x1xf32, #tpu.memory_space<vmem>>, vector<1x1xf32>
    %21 = vector.broadcast %20 : vector<1x1xf32> to vector<1x128xf32>
    %22 = arith.addf %19, %21 : vector<1x128xf32>
    %23 = arith.negf %22 : vector<1x128xf32>
    %24 = math.exp %23 : vector<1x128xf32>
    %cst_17 = arith.constant 1.000000e+00 : f32
    %25 = vector.broadcast %cst_17 : f32 to vector<1x128xf32>
    %26 = arith.addf %25, %24 : vector<1x128xf32>
    %27 = arith.divf %25, %26 : vector<1x128xf32>
    %c0_18 = arith.constant 0 : index
    %c0_19 = arith.constant 0 : index
    %28 = vector.load %arg8[%c0_18, %c0_19] : memref<1x128xf32, #tpu.memory_space<vmem>>, vector<1x128xf32>
    tpu.vector_store %arg8[%c0_18, %c0_19], %27 {strides = array<i32>} : memref<1x128xf32, #tpu.memory_space<vmem>>, vector<1x128xf32>,
    return
  }
  func.func @transform_0(%arg0: i32) -> (i32, i32) {
    %c0_i32 = arith.constant 0 : i32
    %c0_i32_0 = arith.constant 0 : i32
    return %arg0, %c0_i32 : i32, i32
  }
  func.func @transform_1(%arg0: i32) -> (i32, i32) {
    %c0_i32 = arith.constant 0 : i32
    %c0_i32_0 = arith.constant 0 : i32
    %c0_i32_1 = arith.constant 0 : i32
    return %c0_i32, %c0_i32_0 : i32, i32
  }
  func.func @transform_2(%arg0: i32) -> (i32, i32) {
    %c0_i32 = arith.constant 0 : i32
    %c0_i32_0 = arith.constant 0 : i32
    %c0_i32_1 = arith.constant 0 : i32
    return %c0_i32, %c0_i32_0 : i32, i32
  }
  func.func @transform_3(%arg0: i32) -> (i32, i32) {
    %c0_i32 = arith.constant 0 : i32
    %c0_i32_0 = arith.constant 0 : i32
    %c0_i32_1 = arith.constant 0 : i32
    return %c0_i32, %c0_i32_0 : i32, i32
  }
  func.func @transform_4(%arg0: i32) -> (i32, i32) {
    %c0_i32 = arith.constant 0 : i32
    %c0_i32_0 = arith.constant 0 : i32
    %c0_i32_1 = arith.constant 0 : i32
    return %c0_i32, %c0_i32_0 : i32, i32
  }
  func.func @transform_5(%arg0: i32) -> (i32, i32) {
    %c0_i32 = arith.constant 0 : i32
    %c0_i32_0 = arith.constant 0 : i32
    %c0_i32_1 = arith.constant 0 : i32
    return %c0_i32, %c0_i32_0 : i32, i32
  }
  func.func @transform_6(%arg0: i32) -> (i32, i32) {
    %c0_i32 = arith.constant 0 : i32
    %c0_i32_0 = arith.constant 0 : i32
    %c0_i32_1 = arith.constant 0 : i32
    return %c0_i32, %c0_i32_0 : i32, i32
  }
  func.func @transform_7(%arg0: i32) -> (i32, i32) {
    %c0_i32 = arith.constant 0 : i32
    %c0_i32_0 = arith.constant 0 : i32
    return %c0_i32, %arg0 : i32, i32
  }
}

</mosaic_0001>

<bundles_post_ra>
// kernel: tpu_custom_call.1
= control target key start
LH: loop header
LB: loop body
LE: loop exit
PB: predicated region body
PF: predicated region fallthrough
CT: control target
= control target key end

     0   :  { %s751_s0 = inlined_call_operand.vmem [shape: f32[128,16], index: 0, kind: input, shape index: {}]   ;;  %s752_s1 = inlined_call_operand.vmem [shape: f32[32,16], index: 1, kind: input, shape index: {}]   ;;  %s753_s2 = inlined_call_operand.vmem [shape: f32[32,1], index: 2, kind: input, shape index: {}]   ;;  %s754_s3 = inlined_call_operand.vmem [shape: f32[16,32], index: 3, kind: input, shape index: {}]   ;;  %s755_s4 = inlined_call_operand.vmem [shape: f32[16,1], index: 4, kind: input, shape index: {}]   ;;  %s756_s5 = inlined_call_operand.vmem [shape: f32[16,1], index: 5, kind: input, shape index: {}]   ;;  %s757_s6 = inlined_call_operand.<no memory space> [shape: f32[1,1], index: 6, kind: input, shape index: {}]   ;;  %s758_s7 = inlined_call_operand.hbm [shape: f32[1,128], index: 7, kind: output, shape index: {}]  }
   0x1   :  { %v12_v0 = vstv %s757_s6 }
   0x2   :  { %13 = vst [vmem:[#allocation2] sm:$0x1] %v12_v0 }
   0x3   :  { %v29_v1 = vld [vmem:[%s751_s0] sm:$0xff]  ;;  %v30_v2 = vld [vmem:[%s751_s0 + $0x8] sm:$0xff]  ;;  %vm73_vm0 = vcmask 130048   ;;  %v31_v3 = vld [vmem:[%s751_s0 + $0x10] sm:$0xff]  ;;  %v560_v7 = vmov 0  }
   0x4   :  { %v472_v4 = vpack.c.bf16 %v30_v2, %v29_v1  ;;  %vm616_vm1 = vmpackc.low %vm73_vm0, %vm73_vm0  ;;  %v32_v6 = vld [vmem:[%s751_s0 + $0x18] sm:$0xff]  ;;  %530 = vset.pattern.permute.xlu0 %v560_v7  ;;  %531 = vset.pattern.permute.xlu1 %v560_v7  ;;  %v45_v9 = vld [vmem:[%s752_s1] sm:$0xff] }
   0x5   :  { %v478_v8 = vpack.c.bf16 %v32_v6, %v31_v3  ;;  %v33_v10 = vld [vmem:[%s751_s0 + $0x20] sm:$0xff]  ;;  %v34_v11 = vld [vmem:[%s751_s0 + $0x28] sm:$0xff]  ;;  %455 = vmatprep.mubr.msk.f32.mxu0 %vm73_vm0, %v45_v9  ;;  %v51_v13 = vld [vmem:[%s753_s2 + $0x10] sm:$0xff] }
   0x6   :  { %474 = vmatprep.subr.msk.bf16.mxu0 %vm616_vm1, %v472_v4  ;;  %v49_v12 = vld [vmem:[%s753_s2] sm:$0xff]  ;;  %65 = vperm.xlu1 %531, %v51_v13   ;;  %v484_v14 = vpack.c.bf16 %v34_v11, %v33_v10  ;;  %v50_v15 = vld [vmem:[%s753_s2 + $0x8] sm:$0xff]  ;;  %v52_v16 = vld [vmem:[%s753_s2 + $0x18] sm:$0xff] }
   0x7   :  { %477 = vmatpush3.bf16.xpose.msk.msra.mxu0 %vm616_vm1, %v472_v4  ;;  %55 = vperm.xlu0 %530, %v49_v12  }
   0x8   :  { %480 = vmatprep.subr.msk.bf16.mxu0 %vm616_vm1, %v478_v8 }
   0x9   :  { %14 = vsyncpa [#allocation4], 0  ;;  %v225_v17 = vld [vmem:[%s755_s4] sm:$0xff]  ;;  %v35_v18 = vld [vmem:[%s751_s0 + $0x30] sm:$0xff]  ;;  %vm237_vm2 = vcmask 261120  }
   0xa   :  { %70 = vperm.xlu1 %531, %v52_v16   ;;  %v36_v19 = vld [vmem:[%s751_s0 + $0x38] sm:$0xff]  ;;  %v226_v20 = vld [vmem:[%s755_s4 + $0x8] sm:$0xff]  ;;  %v321_v22 = vld [vmem:[%s756_s5] sm:$0xff] }
   0xb   :  { %60 = vperm.xlu0 %530, %v50_v15   ;;  %v490_v21 = vpack.c.bf16 %v36_v19, %v35_v18  ;;  %v322_v23 = vld [vmem:[%s756_s5 + $0x8] sm:$0xff]  ;;  %v342_v24 = vld [vmem:[#allocation2] sm:$0x1]  ;;  %v39_v28 = vld [vmem:[%s751_s0 + $0x50] sm:$0xff] }
   0xc   :  { %v37_v25 = vld [vmem:[%s751_s0 + $0x40] sm:$0xff]  ;;  %v38_v26 = vld [vmem:[%s751_s0 + $0x48] sm:$0xff]  ;;  %v40_v29 = vld [vmem:[%s751_s0 + $0x58] sm:$0xff] }
   0xd   :  { %v496_v27 = vpack.c.bf16 %v38_v26, %v37_v25  ;;  %v502_v30 = vpack.c.bf16 %v40_v29, %v39_v28  ;;  %v41_v31 = vld [vmem:[%s751_s0 + $0x60] sm:$0xff]  ;;  %v42_v32 = vld [vmem:[%s751_s0 + $0x68] sm:$0xff]  ;;  %v43_v34 = vld [vmem:[%s751_s0 + $0x70] sm:$0xff] }
   0xe   :  { %234 = vperm.xlu1 %531, %v226_v20   ;;  %v508_v33 = vpack.c.bf16 %v42_v32, %v41_v31  ;;  %v44_v35 = vld [vmem:[%s751_s0 + $0x78] sm:$0xff]  ;;  %v46_v37 = vld [vmem:[%s752_s1 + $0x8] sm:$0xff]  ;;  %v47_v38 = vld [vmem:[%s752_s1 + $0x10] sm:$0xff] }
   0xf   :  { %483 = vmatpush3.bf16.xpose.msk.msra.mxu0 %vm616_vm1, %v478_v8  ;;  %229 = vperm.xlu0 %530, %v225_v17   ;;  %v514_v36 = vpack.c.bf16 %v44_v35, %v43_v34  ;;  %v48_v39 = vld [vmem:[%s752_s1 + $0x18] sm:$0xff]  ;;  %v223_v40 = vld [vmem:[%s754_s3] sm:$0xff]  ;;  %v224_v59 = vld [vmem:[%s754_s3 + $0x8] sm:$0xff]  ;;  %v348_v8 = vlaneseq  ;;  %s561_s3 = smov [#allocation3]  }
  0x10   :  { %486 = vmatprep.subr.msk.bf16.mxu0 %vm616_vm1, %v484_v14  ;;  %469 = vmatprep.mubr.msk.f32.mxu1 %vm237_vm2, %v223_v40  ;;  %s366_s6 = sshll.u32 %s561_s3, 4  ;;  %s367_s6 = int_to_ptr.vmem [resolvable:$true] %s366_s6 }
  0x11   :  { %v349_v11 = vshrl.u32 %v348_v8, 7  ;;  %s536_s9 = scalar_lea.vmem %s367_s6, 16  ;;  %s540_s10 = scalar_lea.vmem %s367_s6, 32 }
  0x12   :  { %330 = vperm.xlu1 %531, %v322_v23   ;;  %p537_p0 = scmp.ne.s32.totalorder %s367_s6, %s536_s9  ;;  %p541_p1 = scmp.lt.s32.totalorder %s367_s6, %s367_s6 }
  0x13   :  { %325 = vperm.xlu0 %530, %v321_v22   ;;  %p542_p2 = scmp.lt.s32.totalorder %s540_s10, %s536_s9 }
  0x15   :  { %p543_p3 = por %p542_p2, %p541_p1 }
  0x17   :  { %489 = vmatpush3.bf16.xpose.msk.msra.mxu0 %vm616_vm1, %v484_v14  ;;  %345 = vperm.xlu0 %530, %v342_v24   ;;  %v350_v14 = vsub.s32 0, %v349_v11  ;;  %p544_p4 = pnand %p543_p3, %p537_p0 }
  0x18   :  { %492 = vmatprep.subr.msk.bf16.mxu0 %vm616_vm1, %v490_v21 }
  0x1f   :  { %495 = vmatpush3.bf16.xpose.msk.msra.mxu0 %vm616_vm1, %v490_v21 }
  0x20   :  { %498 = vmatprep.subr.msk.bf16.mxu0 %vm616_vm1, %v496_v27 }
  0x27   :  { %501 = vmatpush3.bf16.xpose.msk.msra.mxu0 %vm616_vm1, %v496_v27 }
  0x28   :  { %504 = vmatprep.subr.msk.bf16.mxu0 %vm616_vm1, %v502_v30 }
  0x2f   :  { %507 = vmatpush3.bf16.xpose.msk.msra.mxu0 %vm616_vm1, %v502_v30 }
  0x30   :  { %510 = vmatprep.subr.msk.bf16.mxu0 %vm616_vm1, %v508_v33 }
  0x37   :  { %513 = vmatpush3.bf16.xpose.msk.msra.mxu0 %vm616_vm1, %v508_v33 }
  0x38   :  { %516 = vmatprep.subr.msk.bf16.mxu0 %vm616_vm1, %v514_v36 }
  0x3f   :  { %519 = vmatpush3.bf16.xpose.msk.msra.mxu0 %vm616_vm1, %v514_v36 }
  0x46   :  { %456 = vmatmul.mubr.msk.f32.vlgmr.msra.gmra.mrb[0].mxu0 %vm73_vm0, %v46_v37 }
  0x47   :  { %458 = vmatprep.mubr.msk.f32.mxu0 %vm73_vm0, %v47_v38 }
  0x4a   :  { %459 = vmatmul.mubr.msk.f32.gmra.mrb[2].mxu0 %vm73_vm0, %v48_v39 }
  0x85   :  { %v66_v42 = vpop.permute.xlu1 %65 }
  0x86   :  { %v56_v41 = vpop.permute.xlu0 %55 }
  0x89   :  { %v71_v49 = vpop.permute.xlu1 %70 }
  0x8a   :  { %v61_v43 = vpop.permute.xlu0 %60 }
  0x8d   :  { %v235_v60 = vpop.permute.xlu1 %234 }
  0x8e   :  { %v230_v61 = vpop.permute.xlu0 %229 }
  0x91   :  { %v331_v3 = vpop.permute.xlu1 %330 }
  0x92   :  { %v326_v5 = vpop.permute.xlu0 %325 }
  0x96   :  { %v346_v16 = vpop.permute.xlu0 %345 }
  0x97   :  { %v351_v18 = vrot.slane %v346_v16, %v350_v14 }
 0x119   :  { %v457_v44 = vpop.f32.mrb[0].mxu0 }
 0x11a   :  { %v206_v45 = vadd.f32 %v457_v44, %v61_v43  ;;  %v200_v46 = vpop.f32.mrb[1].mxu0 }
 0x11b   :  { %v201_v47 = vadd.f32 %v200_v46, %v56_v41 }
 0x11c   :  { %v220_v48 = vmax.f32 %v206_v45, 0.0 }
 0x11d   :  { %v219_v50 = vmax.f32 %v201_v47, 0.0  ;;  %v460_v51 = vpop.f32.mrb[2].mxu0 }
 0x11e   :  { %v216_v52 = vadd.f32 %v460_v51, %v71_v49  ;;  %v210_v53 = vpop.f32.mrb[3].mxu0 }
 0x11f   :  { %v211_v54 = vadd.f32 %v210_v53, %v66_v42  ;;  %v520_v55 = vpack.c.bf16 %v220_v48, %v219_v50 }
 0x120   :  { %v222_v56 = vmax.f32 %v216_v52, 0.0 }
 0x121   :  { %v221_v57 = vmax.f32 %v211_v54, 0.0  ;;  %521 = vmatprep.subr.bf16.mxu1 %v520_v55 }
 0x122   :  { %523 = vmatpush3.bf16.msra.mxu1 %v520_v55 }
 0x123   :  { %v524_v58 = vpack.c.bf16 %v222_v56, %v221_v57 }
 0x125   :  { %525 = vmatprep.subr.bf16.mxu1 %v524_v58 }
 0x126   :  { %527 = vmatpush3.bf16.msra.mxu1 %v524_v58 }
 0x129   :  { %470 = vmatmul.mubr.msk.f32.vlgmr.msra.gmra.mrb[0].mxu1 %vm237_vm2, %v224_v59 }
 0x1fc   :  { %v471_v62 = vpop.f32.mrb[0].mxu1 }
 0x1fd   :  { %v316_v63 = vadd.f32 %v471_v62, %v235_v60  ;;  %v310_v0 = vpop.f32.mrb[1].mxu1 }
 0x1fe   :  { %v311_v1 = vadd.f32 %v310_v0, %v230_v61 }
 0x1ff   :  { %v320_v2 = vmax.f32 %v316_v63, 0.0 }
 0x200   :  { %v319_v4 = vmax.f32 %v311_v1, 0.0 }
 0x201   :  { %v334_v6 = vmul.f32 %v331_v3, %v320_v2 }
 0x202   :  { %v333_v7 = vmul.f32 %v326_v5, %v319_v4 }
 0x204   :  { %v335_v9 = vadd.f32 %v334_v6, %v333_v7 }
 0x206   :  { %v336_v10 = vrot.slane %v335_v9, 4 }
 0x208   :  { %v337_v12 = vadd.f32 %v336_v10, %v335_v9 }
 0x20a   :  { %v338_v13 = vrot.slane %v337_v12, 2 }
 0x20c   :  { %v339_v15 = vadd.f32 %v338_v13, %v337_v12 }
 0x20e   :  { %v340_v17 = vrot.slane %v339_v15, 1 }
 0x210   :  { %v341_v19 = vadd.f32 %v340_v17, %v339_v15 }
 0x212   :  { %v352_v20 = vadd.f32 %v351_v18, %v341_v19 }
 0x214   :  { %v396_v21 = vmul.f32 -1.442695, %v352_v20 }
 0x216   :  { %532 = vpow2.f32 %v396_v21 }
 0x220   :  { %v533_v22 = vpop.eup %532 }
 0x221   :  { %v356_v23 = vadd.f32 1.0, %v533_v22 }
 0x223   :  { %534 = vrcp.f32 %v356_v23 }
 0x22d   :  { %v535_v24 = vpop.eup %534 }
 0x22e   :  { %359 = vst [vmem:[#allocation3] sm:$0x1] %v535_v24 }
 0x22f   :  { %547 = shalt.err (!%p544_p4)
}
 0x230   :  { %s548_s12 = scalar_lea.hbm %s758_s7, 16 }
 0x231   :  { %p549_p5 = scmp.ne.s32.totalorder %s758_s7, %s548_s12  ;;  %p552_p6 = scmp.lt.u32.totalorder %s548_s12, %s758_s7 }
 0x233   :  { %p554_p7 = pnand %p552_p6, %p549_p5 }
 0x235   :  { %557 = shalt.err (!%p554_p7)
}
 0x236   :  { %369 = dma.vmem_to_hbm [thread:$0]  %s367_s6, 16, %s758_s7, [#allocation4]  }
 0x237   :  { %558 = dma.done.wait [#allocation4], 16  }
 0x238   :  { %559 = vsyncadd [#allocation4], 4294967280 }
 0x239   :  { %373 = vsyncpa [#allocation4], 1 }

</bundles_post_ra>
